<compile_context>
chip_gen: v5e
topology: v5e:2x2
jax: 0.10.0
libtpu: 0.0.40
codegen_flags: <defaults>
</compile_context>

<pallas_src>
import jax
import jax.numpy as jnp
from jax.experimental import pallas as pl
from jax.experimental.pallas import tpu as pltpu


def _dw_down_reduce_kernel(x_ref, w_ref, b_ref, o_ref):
    # x_ref: (4C, ts)  raw sub-pixel columns [a;b;c;d] stacked on sublanes
    # w_ref: (2C, 4C)  1x1-conv weight with Haar butterflies + BN scale folded in
    # b_ref: (2C, 1)   folded BN bias
    # o_ref: (2C, ts)
    y = jnp.dot(w_ref[...], x_ref[...], preferred_element_type=jnp.float32)
    o_ref[...] = jnp.maximum(y + b_ref[...], 0.0).astype(o_ref.dtype)


def _choose_tile_s(C, itemsize):
    """Largest lane tile keeping the double-buffered working set well under the
    v7x default scoped-VMEM budget (~32 MiB); v5e/v6e have more headroom."""
    C2, C4 = 2 * C, 4 * C
    w_bytes = C2 * C4 * itemsize + C2 * itemsize      # resident weight + bias
    budget = 24 * 1024 * 1024 - 2 * w_bytes           # leave headroom
    per_col = 2 * (C4 + C2) * itemsize                # double-buffered in + out columns
    ts = (max(budget, per_col * 128) // per_col) // 128 * 128
    return int(max(128, min(2048, ts)))


def dw_down_reduce(x, conv_w, bn_gamma, bn_beta, bn_mean, bn_var,
                   eps=1e-3, tile_s=None, compute_dtype=None):
    """x: NCHW float32 (B, C, H, W), H and W even.
    conv_w: (2C, 4C) squeezed 1x1 conv weight (acting on [yL|yHL|yLH|yHH]).
    Returns NCHW (B, 2C, H//2, W//2)."""
    B, C, H, W = x.shape
    assert H % 2 == 0 and W % 2 == 0
    H2, W2 = H // 2, W // 2
    C2, C4 = 2 * C, 4 * C
    S = H2 * W2
    cdt = jnp.float32 if compute_dtype is None else compute_dtype

    # --- Single permute: NCHW -> (B, [h_sub, w_sub, C] = 4C, H2*W2). One HBM pass. ---
    xp = x.astype(cdt).reshape(B, C, H2, 2, W2, 2)
    xp = jnp.transpose(xp, (0, 3, 5, 1, 2, 4)).reshape(B, C4, S)

    # --- Fold Haar DWT + eval-mode BN into the 1x1 conv weight / bias. ---
    cw = conv_w.astype(jnp.float32)
    w_LL, w_H0, w_H1, w_H2 = cw[:, :C], cw[:, C:2 * C], cw[:, 2 * C:3 * C], cw[:, 3 * C:]
    w_a = 0.5 * (w_LL + w_H0 + w_H1 + w_H2)   # applied to x[:, :, 0::2, 0::2]
    w_b = 0.5 * (w_LL + w_H0 - w_H1 - w_H2)   # applied to x[:, :, 0::2, 1::2]
    w_c = 0.5 * (w_LL - w_H0 + w_H1 - w_H2)   # applied to x[:, :, 1::2, 0::2]
    w_d = 0.5 * (w_LL - w_H0 - w_H1 + w_H2)   # applied to x[:, :, 1::2, 1::2]
    scale = bn_gamma.astype(jnp.float32) / jnp.sqrt(bn_var.astype(jnp.float32) + eps)
    w_folded = (scale[:, None] *
                jnp.concatenate([w_a, w_b, w_c, w_d], axis=1)).astype(cdt)     # (2C, 4C)
    bias = (bn_beta.astype(jnp.float32)
            - bn_mean.astype(jnp.float32) * scale).reshape(C2, 1)              # (2C, 1)

    # --- Tile the spatial lane axis (pad if needed; padded columns are sliced off). ---
    if tile_s is None:
        tile_s = _choose_tile_s(C, jnp.dtype(cdt).itemsize)
    if S <= tile_s:
        ts, s_pad = S, S
    else:
        ts = tile_s
        s_pad = pl.cdiv(S, ts) * ts
        if s_pad != S:
            xp = jnp.pad(xp, ((0, 0), (0, 0), (0, s_pad - S)))

    out = pl.pallas_call(
        _dw_down_reduce_kernel,
        out_shape=jax.ShapeDtypeStruct((B, C2, s_pad), jnp.float32),
        grid_spec=pltpu.PrefetchScalarGridSpec(
            num_scalar_prefetch=0,
            grid=(B, s_pad // ts),
            in_specs=[pl.BlockSpec((None, C4, ts), lambda b, s: (b, 0, s)),
                      pl.BlockSpec((C2, C4), lambda b, s: (0, 0)),
                      pl.BlockSpec((C2, 1), lambda b, s: (0, 0))],
            out_specs=pl.BlockSpec((None, C2, ts), lambda b, s: (b, 0, s)),
        ),
        compiler_params=pltpu.CompilerParams(
            dimension_semantics=("parallel", "parallel")),
    )(xp, w_folded, bias)

    if s_pad != S:
        out = out[:, :, :S]
    return out.reshape(B, C2, H2, W2)      # already NCHW: no output transpose needed


def _reference(x, conv_w, gamma, beta, mean, var, eps=1e-3):
    p00 = x[:, :, 0::2, 0::2]
    p01 = x[:, :, 0::2, 1::2]
    p10 = x[:, :, 1::2, 0::2]
    p11 = x[:, :, 1::2, 1::2]
    yL  = 0.5 * (p00 + p01 + p10 + p11)
    yH0 = 0.5 * (p00 + p01 - p10 - p11)
    yH1 = 0.5 * (p00 - p01 + p10 - p11)
    yH2 = 0.5 * (p00 - p01 - p10 + p11)
    x1 = jnp.concatenate([yL, yH0, yH1, yH2], axis=1)
    y = jnp.einsum('oc,bchw->bohw', conv_w, x1)
    scale = gamma / jnp.sqrt(var + eps)
    bias = beta - mean * scale
    y = y * scale[None, :, None, None] + bias[None, :, None, None]
    return jnp.maximum(y, 0.0)


if __name__ == "__main__":
    key = jax.random.PRNGKey(0)
    k_x, k_w, k_g, k_b, k_m, k_v = jax.random.split(key, 6)

    B, C, H, W = 2, 4, 16, 16
    C2, C4 = 2 * C, 4 * C

    x = jax.random.normal(k_x, (B, C, H, W), dtype=jnp.float32)

    # Deterministic synthetic parameters (matches module __init__ shapes):
    #   Conv2d(4C, 2C, 1, bias=False).weight -> (2C, 4C, 1, 1) (squeezed here)
    #   BatchNorm2d(2C): weight, bias, running_mean, running_var
    conv_w = jax.random.normal(k_w, (C2, C4), dtype=jnp.float32) * (1.0 / jnp.sqrt(C4))
    bn_gamma = 1.0 + 0.1 * jax.random.normal(k_g, (C2,), dtype=jnp.float32)
    bn_beta = 0.1 * jax.random.normal(k_b, (C2,), dtype=jnp.float32)
    bn_mean = 0.1 * jax.random.normal(k_m, (C2,), dtype=jnp.float32)
    bn_var = 1.0 + 0.1 * jax.random.uniform(k_v, (C2,), dtype=jnp.float32)

    out = dw_down_reduce(x, conv_w, bn_gamma, bn_beta, bn_mean, bn_var)
    out = jax.block_until_ready(out)

    ref = _reference(x, conv_w, bn_gamma, bn_beta, bn_mean, bn_var)
    assert out.shape == (B, C2, H // 2, W // 2), out.shape
    assert jnp.allclose(out, ref, atol=1e-5, rtol=1e-5), float(jnp.abs(out - ref).max())

    print("KERNEL_OK")
</pallas_src>

<mosaic_0001>
module attributes {stable_mosaic.version = 11 : i64} {
  func.func @_dw_down_reduce_kernel(%arg0: i32, %arg1: i32, %arg2: memref<1x16x64xf32, #tpu.memory_space<vmem>>, %arg3: memref<8x16xf32, #tpu.memory_space<vmem>>, %arg4: memref<8x1xf32, #tpu.memory_space<vmem>>, %arg5: memref<1x8x64xf32, #tpu.memory_space<vmem>>) attributes {dimension_semantics = [#tpu.dimension_semantics<parallel>, #tpu.dimension_semantics<parallel>], iteration_bounds = array<i64: 2, 1>, scalar_prefetch = 0 : i64, scratch_operands = 0 : i64, tpu.core_type = #tpu.core_type<tc>, window_params = [{transform_indices = @transform_0, window_bounds = array<i64: 1, 16, 64>}, {pipeline_mode = #tpu.pipeline_mode<synchronous>, transform_indices = @transform_1, window_bounds = array<i64: 8, 16>}, {pipeline_mode = #tpu.pipeline_mode<synchronous>, transform_indices = @transform_2, window_bounds = array<i64: 8, 1>}, {transform_indices = @transform_3, window_bounds = array<i64: 1, 8, 64>}]} {
    %c0 = arith.constant 0 : index
    %c0_0 = arith.constant 0 : index
    %0 = vector.load %arg3[%c0, %c0_0] : memref<8x16xf32, #tpu.memory_space<vmem>>, vector<8x16xf32>
    %c0_1 = arith.constant 0 : index
    %c0_2 = arith.constant 0 : index
    %c0_3 = arith.constant 0 : index
    %1 = vector.load %arg2[%c0_1, %c0_2, %c0_3] : memref<1x16x64xf32, #tpu.memory_space<vmem>>, vector<1x16x64xf32>
    %2 = vector.shape_cast %1 : vector<1x16x64xf32> to vector<16x64xf32>
    %cst = arith.constant dense<0.000000e+00> : vector<8x64xf32>
    %3 = tpu.matmul %0, %2, %cst {dimension_numbers = #tpu.dot_dimension_numbers<[1], [0], [0], [1], [0, 0, 1, 1], [], []>} : vector<8x16xf32>, vector<16x64xf32>, vector<8x64xf32> -> vector<8x64xf32>
    %c0_4 = arith.constant 0 : index
    %c0_5 = arith.constant 0 : index
    %4 = vector.load %arg4[%c0_4, %c0_5] : memref<8x1xf32, #tpu.memory_space<vmem>>, vector<8x1xf32>
    %5 = vector.broadcast %4 : vector<8x1xf32> to vector<8x64xf32>
    %6 = arith.addf %3, %5 : vector<8x64xf32>
    %cst_6 = arith.constant 0.000000e+00 : f32
    %7 = vector.broadcast %cst_6 : f32 to vector<8x64xf32>
    %8 = arith.maximumf %6, %7 : vector<8x64xf32>
    %c0_7 = arith.constant 0 : index
    %c0_8 = arith.constant 0 : index
    %c0_9 = arith.constant 0 : index
    %9 = vector.load %arg5[%c0_7, %c0_8, %c0_9] : memref<1x8x64xf32, #tpu.memory_space<vmem>>, vector<1x8x64xf32>
    %10 = vector.shape_cast %9 : vector<1x8x64xf32> to vector<8x64xf32>
    %11 = vector.shape_cast %8 : vector<8x64xf32> to vector<1x8x64xf32>
    tpu.vector_store %arg5[%c0_7, %c0_8, %c0_9], %11 {strides = array<i32>} : memref<1x8x64xf32, #tpu.memory_space<vmem>>, vector<1x8x64xf32>,
    return
  }
  func.func @transform_0(%arg0: i32, %arg1: i32) -> (i32, i32, i32) {
    %c0_i32 = arith.constant 0 : i32
    %c0_i32_0 = arith.constant 0 : i32
    return %arg0, %c0_i32, %arg1 : i32, i32, i32
  }
  func.func @transform_1(%arg0: i32, %arg1: i32) -> (i32, i32) {
    %c0_i32 = arith.constant 0 : i32
    %c0_i32_0 = arith.constant 0 : i32
    %c0_i32_1 = arith.constant 0 : i32
    return %c0_i32, %c0_i32_0 : i32, i32
  }
  func.func @transform_2(%arg0: i32, %arg1: i32) -> (i32, i32) {
    %c0_i32 = arith.constant 0 : i32
    %c0_i32_0 = arith.constant 0 : i32
    %c0_i32_1 = arith.constant 0 : i32
    return %c0_i32, %c0_i32_0 : i32, i32
  }
  func.func @transform_3(%arg0: i32, %arg1: i32) -> (i32, i32, i32) {
    %c0_i32 = arith.constant 0 : i32
    %c0_i32_0 = arith.constant 0 : i32
    return %arg0, %c0_i32, %arg1 : i32, i32, i32
  }
}

</mosaic_0001>

<bundles_post_ra>
// kernel: tpu_custom_call.1
= control target key start
LH: loop header
LB: loop body
LE: loop exit
PB: predicated region body
PF: predicated region fallthrough
CT: control target
= control target key end

     0   :  { %8 = vsyncpa [#allocation3], 0  ;;  %s688_s0 = inlined_call_operand.hbm [shape: f32[2,16,64], index: 0, kind: input, shape index: {}]   ;;  %s689_s1 = inlined_call_operand.vmem [shape: f32[8,16], index: 1, kind: input, shape index: {}]   ;;  %s690_s2 = inlined_call_operand.vmem [shape: f32[8,1], index: 2, kind: input, shape index: {}]   ;;  %s691_s3 = inlined_call_operand.hbm [shape: f32[2,8,64], index: 3, kind: output, shape index: {}]  }
   0x1   :  { %10 = vsyncpa [#allocation3 + $0x1], 0 }
   0x2   :  { %11 = vsyncpa [#allocation4], 0 }
   0x3   :  { %13 = vsyncpa [#allocation4 + $0x1], 0  ;;  %s561_s12 = smov 0   ;;  %s563_s13 = smov 0  }
   0x4   :  { %s565_s14 = smov 0   ;;  %s567_s15 = smov 0  }
   0x5   :  { %s569_s16 = smov 0   ;;  %s571_s17 = smov 0  }
   0x6 LB: > { %s342_s18 = sadd.s32 4294967295, %s536_s17   ;;  %s343_s19 = sadd.s32 4294967294, %s536_s17   ;;  %s536_s17 = sphi %s571_s17, %s19_s17   ;;  %s532_s16 = sphi %s569_s16, %s700_s16   ;;  %s528_s15 = sphi %s567_s15, %s699_s15   ;;  %s524_s14 = sphi %s565_s14, %s698_s14   ;;  %s520_s13 = sphi %s563_s13, %s697_s13   ;;  %s516_s12 = sphi %s561_s12, %s696_s12  }
   0x7   : > { %s31_s20 = sadd.s32 1, %s532_s16  ;;  %s40_s21 = sadd.s32 1, %s524_s14 }
   0x8   : > { %p33_p0 = scmp.ge.s32.totalorder %s31_s20, 2  ;;  %p47_p1 = scmp.ne.s32.totalorder %s524_s14, %s520_s13 }
   0x9   : > { %p48_p2 = scmp.eq.s32.totalorder %s536_s17, 0  ;;  %p53_p3 = scmp.ne.s32.totalorder %s520_s13, %s516_s12 }
   0xa   : > { %s702_s20 = smov (%p33_p0, %s31_s20), 0  ;;  %p54_p5 = scmp.eq.s32.totalorder %s342_s18, 0 }
   0xb   : > { %p602_p4 = por %p48_p2, %p47_p1  ;;  %s35_s23 = ssub.s32 %s532_s16, %s702_s20 }
   0xc   : > { %p121_p6 = scmp.eq.s32.totalorder %s342_s18, 1  ;;  %p38_p7 = scmp.eq.s32.totalorder %s35_s23, 0 }
   0xd   : > { %p608_p8 = por %p54_p5, %p53_p3  ;;  %p127_p10 = scmp.eq.s32.totalorder %s343_s19, 1 }
   0xe   : > { %p612_p9 = por %p121_p6, %p47_p1  ;;  %p345_p12 = scmp.ge.s32.totalorder %s536_s17, 2 }
   0xf   : > { %s617_s26 = scalar_select %p38_p7, %s524_s14, %s40_s21  }
  0x10   : > { %p619_p11 = por %p127_p10, %p53_p3  ;;  %p370_p13 = scmp.lt.s32.totalorder %s536_s17, 2 }
  0x11   : > { %s153_s28 = sand.u32 1, %s524_s14   ;;  %s357_s30 = sshll.u32 %s532_s16, 4 }
  0x12   : > { %s346_s29 = sshll.u32 %s153_s28, 4  ;;  %s163_s6 = scalar_lea.hbm %s688_s0, %s357_s30 }
  0x13   : > { %s157_s7 = scalar_lea.vmem [#allocation2], %s346_s29  ;;  %s164_s9 = sshll.u32 %s163_s6, 4  ;;  %s165_s9 = int_to_ptr.hbm [resolvable:$true] %s164_s9 }
  0x14   : > { %s166_s8 = sshll.u32 %s157_s7, 4  ;;  %p363_p0 = pnand %p370_p13, %p602_p4  ;;  %s167_s8 = int_to_ptr.vmem [resolvable:$true] %s166_s8 }
  0x15   : > { %p349_p1 = scmp.ge.s32.totalorder %s536_s17, 1  ;;  %s154_s10 = scalar_lea.sflag [#allocation3], %s153_s28 }
  0x16   : > { %s538_s11 = smov 128   ;;  %s539_s18 = smov 8  }
  0x17   : > { %365 = dma.hbm_to_vmem [thread:$0]  (!%p363_p0), %s165_s9, 256, %s167_s8, %s154_s10, %s538_s11, %s538_s11, %s539_s18  }
  0x18   : > { %p174_p2 = scmp.lt.s32.totalorder %s536_s17, 3 }
  0x1a   : > { %p175_p3 = pnand %p349_p1, %p174_p2 }
  0x1b   : > { %s635_s19 = sand.u32 (!%p175_p3), 1, %s520_s13  }
  0x1c   : > { %178 = sbr.rel (%p175_p3) target bundleno = 171 (0xab), region = 32  ;;  %s350_s21 = sshll.u32 (!%p175_p3), %s635_s19, 4 }
  0x1d   : > { %s181_s23 = scalar_lea.sflag (!%p175_p3), [#allocation3], %s635_s19  ;;  %s184_s29 = scalar_lea.vmem (!%p175_p3), [#allocation2], %s350_s21 }
  0x21   : > { %507 = dma.done.wait (%p608_p8), %s181_s23, 256  }
  0x22   : > { %509 = vsyncadd (%p608_p8), %s181_s23, 4294967040  ;;  %v540_v0 = vmov 0   ;;  %v210_v1 = vld [vmem:[%s184_s29 + $0x8] sm:$0xff]  ;;  %v209_v2 = vld [vmem:[%s184_s29] sm:$0xff]  ;;  %vm217_vm0 = vcmask 130048   ;;  %s351_s24 = sshll.u32 %s635_s19, 3 }
  0x23   : > { %423 = vset.pattern.permute.xlu0 %v540_v0  ;;  %235 = vmatpush.msra.mxu0 %v210_v1  ;;  %v208_v3 = vld [vmem:[%s689_s1] sm:$0xff]  ;;  %s354_s5 = sshll.u32 %s528_s15, 3  ;;  %s207_s9 = scalar_lea.vmem [#allocation5], %s351_s24  ;;  %vm242_vm1 = vcmask 523264  }
  0x24   : > { %v211_v4 = vld [vmem:[%s690_s2] sm:$0xff]  ;;  %s256_s8 = scalar_lea.hbm %s691_s3, %s354_s5  ;;  %s258_s10 = sshll.u32 %s207_s9, 4  ;;  %s259_s10 = int_to_ptr.vmem [resolvable:$true] %s258_s10 }
  0x25   : > { %214 = vperm.xlu0 %423, %v211_v4   ;;  %236 = vmatpush.msra.mxu0 %v209_v2  ;;  %s260_s11 = sshll.u32 %s256_s8, 4  ;;  %s245_s18 = scalar_lea.sflag [#allocation4], %s635_s19  ;;  %s261_s11 = int_to_ptr.hbm [resolvable:$true] %s260_s11 }
  0x26   : > { %352 = vmatmul.msk.f32.vlgmr.msra.gmra.mxu0 %vm217_vm0, %v208_v3  ;;  %s468_s21 = sshra.s32 %s261_s11, 4  ;;  %s474_s22 = scalar_lea.hbm %s691_s3, 16  ;;  %s469_s21 = int_to_ptr.hbm [resolvable:$true] %s468_s21 }
  0x27   : > { %s470_s15 = scalar_lea.hbm %s469_s21, 8  ;;  %p475_p7 = scmp.lt.s32.totalorder %s469_s21, %s691_s3 }
  0x28   : > { %p471_p4 = scmp.ne.s32.totalorder %s469_s21, %s470_s15  ;;  %p476_p8 = scmp.lt.s32.totalorder %s474_s22, %s470_s15 }
  0x2a   : > { %p472_p5 = pnand %p471_p4, %p612_p9  ;;  %p477_p10 = por %p476_p8, %p475_p7 }
  0x2c   : > { %p473_p6 = pneg %p472_p5 }
  0x2e   : > { %p478_p13 = pnand %p477_p10, %p473_p6 }
  0x97   : > { %v215_v5 = vpop.permute.xlu0 %214 }
  0xa3   : > { %v238_v6 = vpop.f32.mrf.mxu0 }
  0xa4   : > { %v239_v7 = vadd.f32 %v238_v6, %v215_v5 }
  0xa6   : > { %v241_v8 = vmax.f32 %v239_v7, 0.0 }
  0xa8   : > { %243 = vst.msk [vmem:[%s207_s9] sm:$0xff] %vm242_vm1, %v241_v8 }
  0xa9   : > { %481 = shalt.err (!%p478_p13)
}
  0xaa   : > { %360 = dma.vmem_to_hbm [thread:$0]  (%p612_p9), %s259_s10, 128, %s261_s11, %s245_s18  }
  0xab PF: > { %s272_s19 = sand.u32 1, %s516_s12   ;;  %p367_p0 = pnand %p345_p12, %p619_p11 }
  0xac   : > { %s273_s4 = scalar_lea.sflag [#allocation4], %s272_s19 }
  0xad   : > { %p368_p1 = pneg %p367_p0 }
  0xaf   : > { %511 = dma.done.wait (%p368_p1), %s273_s4, 128  }
  0xb0   : > { %513 = vsyncadd (%p368_p1), %s273_s4, 4294967168  ;;  %s19_s17 = sadd.s32 1, %s536_s17   ;;  %s696_s12 = smov %s520_s13 }
  0xb1   : > { %p16_p2 = scmp.ge.s32.totalorder %s19_s17, 4   ;;  %s697_s13 = smov %s524_s14 }
  0xb2   : > { %s698_s14 = smov %s617_s26  ;;  %s699_s15 = smov %s532_s16 }
  0xb3   : > { %s700_s16 = smov %s702_s20  ;;  %18 = sbr.rel (!%p16_p2) target bundleno = 6 (0x6), region = 77 }
  0xb8   :  { %279 = vsyncpa [#allocation3], 1 }
  0xb9   :  { %281 = vsyncpa [#allocation3 + $0x1], 1 }
  0xba   :  { %282 = vsyncpa [#allocation4], 1 }
  0xbb   :  { %284 = vsyncpa [#allocation4 + $0x1], 1 }

</bundles_post_ra>
